<compile_context>
chip_gen: v6e
topology: v6e:2x2x1
jax: 0.10.0
libtpu: 0.0.40
codegen_flags: <defaults>
</compile_context>

<pallas_src>
import functools

import jax
import jax.numpy as jnp
from jax import lax
from jax.experimental import pallas as pl
from jax.experimental.pallas import tpu as pltpu

_LANE = 128


def _round_up(x, m):
    return (x + m - 1) // m * m


def _choose_block_rows(n_pad, d_pad, budget_bytes=24 << 20):
    """Largest dest-row tile (multiple of 128 that divides n_pad) whose per-step
    attention working set stays under a conservative, v7x-safe VMEM budget."""
    for tm in (512, 256, 128):
        if tm > n_pad or n_pad % tm:
            continue
        per_step = (tm * n_pad * 10          # e/p f32 + alpha bf16 temporaries
                    + 4 * tm * d_pad * 4     # double-buffered z/out tiles
                    + 4 * tm * _LANE * 4)    # double-buffered score panels
        resident = n_pad * d_pad * 2 + 8 * n_pad * 4
        if per_step + resident <= budget_bytes:
            return tm
    # TODO(synk): for N so large that even a (128, N_pad) score tile blows the
    # budget, also tile the source axis with a flash-style online softmax
    # (m/l/acc scratch + pl.when init/finalize, source axis last, "arbitrary").
    return min(n_pad, _LANE)


def _vmem_limit_bytes(n_pad, d_pad, in_pad, tm):
    resident = n_pad * d_pad * 2 + 8 * n_pad * 4 + in_pad * (d_pad + _LANE) * 2
    per_step = (tm * n_pad * 10 + 4 * tm * d_pad * 4 + 4 * tm * _LANE * 4
                + 2 * tm * in_pad * 4)
    # Cap at 64 MiB so the same setting is valid on v7x (64 MiB physical VMEM).
    return int(min(64 << 20, max(32 << 20, 2 * (resident + per_step))))


# --------------------------------------------------------------------------
# Kernel 1: row-tiled projection.  z_aug = [elu?](h) @ fc_aug in bf16 with f32
# accumulation; fc_aug carries the folded dest-attention column.  Also emits
# the per-source score row lane-dense via a (1,K)x(tm,K) contraction.
# --------------------------------------------------------------------------
def _proj_kernel(h_ref, fc_ref, csrc_ref, z_ref, sdst_ref, ssrc_ref,
                 *, d_pad, apply_elu):
    h = h_ref[...]                                        # (tm, in_pad) f32
    if apply_elu:                                         # fused F.elu (alpha=1)
        h = jnp.where(h > 0.0, h, jnp.expm1(h))
    hb = h.astype(jnp.bfloat16)

    # Single folded matmul: columns [0:d_pad] = Z, column d_pad = s_dst.
    zaug = jnp.dot(hb, fc_ref[...], preferred_element_type=jnp.float32)
    z_ref[...] = zaug[:, :d_pad].astype(jnp.bfloat16)     # (tm, d_pad) bf16
    sdst_ref[...] = zaug[:, d_pad:]                       # (tm, 128)   f32

    # Per-source score row, produced directly in lane-major (1, tm) layout.
    ssrc_ref[...] = lax.dot_general(
        csrc_ref[...], hb,
        dimension_numbers=(((1,), (1,)), ((), ())),
        preferred_element_type=jnp.float32)               # (1, tm) f32


# --------------------------------------------------------------------------
# Kernel 2: destination-row-tiled attention.  Builds a (tm, N_pad) relu+softmax
# tile in f32 and accumulates alpha @ Z on the MXU in bf16 / f32-acc.
# --------------------------------------------------------------------------
def _attn_kernel(z_ref, sdst_ref, ssrc_ref, out_ref, *, n_real, n_pad):
    s_dst = sdst_ref[...][:, 0:1]                         # (tm, 1)     f32
    s_src = ssrc_ref[...]                                 # (1, n_pad)  f32

    e = jnp.maximum(s_dst + s_src, 0.0)                   # relu, (tm, n_pad)
    if n_real < n_pad:                                    # mask padded sources
        col = lax.broadcasted_iota(jnp.int32, e.shape, 1)
        e = jnp.where(col < n_real, e, -1e30)

    m = jnp.max(e, axis=1, keepdims=True)
    p = jnp.exp(e - m)
    denom = jnp.sum(p, axis=1, keepdims=True)
    alpha = (p * pl.reciprocal(denom, approx=True)).astype(jnp.bfloat16)

    out_ref[...] = jnp.dot(alpha, z_ref[...],
                           preferred_element_type=jnp.float32)


# --------------------------------------------------------------------------
# Padded single-layer driver.
# --------------------------------------------------------------------------
def _gat_layer_padded(h_pad, fc_weight, attn_weight, n_real, *, apply_elu=False):
    """One GAT layer on padded node features.

    h_pad:       (n_pad, in_pad) f32; rows >= n_real / cols >= in_dim are padding.
    fc_weight:   (in_dim, out_dim) f32 (unpadded).
    attn_weight: (2*out_dim, 1) f32.
    returns      (n_pad, d_pad) f32; cols >= out_dim are zero, rows >= n_real
                 are don't-care (never read by a subsequent layer).
    """
    n_pad, in_pad = h_pad.shape
    in_dim, out_dim = fc_weight.shape
    assert attn_weight.shape == (2 * out_dim, 1)
    assert in_dim <= in_pad and n_pad % _LANE == 0

    d_pad = _round_up(out_dim, _LANE)
    d_aug = d_pad + _LANE

    a_src = attn_weight[:out_dim, 0]
    a_dst = attn_weight[out_dim:, 0]

    # Fold the dest-attention vector into the projection weight (lane-dense).
    fc_aug = jnp.zeros((in_pad, d_aug), jnp.float32)
    fc_aug = fc_aug.at[:in_dim, :out_dim].set(fc_weight)
    fc_aug = fc_aug.at[:in_dim, d_pad].set(fc_weight @ a_dst)
    fc_aug = fc_aug.astype(jnp.bfloat16)

    # Folded src-attention vector as a (1, in_pad) row.
    c_src = jnp.zeros((1, in_pad), jnp.float32).at[0, :in_dim].set(fc_weight @ a_src)
    c_src = c_src.astype(jnp.bfloat16)

    tm = _choose_block_rows(n_pad, d_pad)
    grid = (n_pad // tm,)
    vmem_limit = _vmem_limit_bytes(n_pad, d_pad, in_pad, tm)
    cparams = pltpu.CompilerParams(dimension_semantics=("parallel",),
                                   vmem_limit_bytes=vmem_limit)

    # ---- projection ----
    z_bf, sdst, ssrc = pl.pallas_call(
        functools.partial(_proj_kernel, d_pad=d_pad, apply_elu=apply_elu),
        out_shape=(
            jax.ShapeDtypeStruct((n_pad, d_pad), jnp.bfloat16),   # Z
            jax.ShapeDtypeStruct((n_pad, _LANE), jnp.float32),    # s_dst panel
            jax.ShapeDtypeStruct((1, n_pad), jnp.float32),        # s_src row
        ),
        grid=grid,
        in_specs=[
            pl.BlockSpec((tm, in_pad), lambda i: (i, 0)),
            pl.BlockSpec((in_pad, d_aug), lambda i: (0, 0)),
            pl.BlockSpec((1, in_pad), lambda i: (0, 0)),
        ],
        out_specs=(
            pl.BlockSpec((tm, d_pad), lambda i: (i, 0)),
            pl.BlockSpec((tm, _LANE), lambda i: (i, 0)),
            pl.BlockSpec((1, tm), lambda i: (0, i)),
        ),
        compiler_params=cparams,
    )(h_pad, fc_aug, c_src)

    # ---- attention + aggregation ----
    out_pad = pl.pallas_call(
        functools.partial(_attn_kernel, n_real=n_real, n_pad=n_pad),
        out_shape=jax.ShapeDtypeStruct((n_pad, d_pad), jnp.float32),
        grid=grid,
        in_specs=[
            pl.BlockSpec((n_pad, d_pad), lambda i: (0, 0)),   # Z resident
            pl.BlockSpec((tm, _LANE), lambda i: (i, 0)),      # s_dst block
            pl.BlockSpec((1, n_pad), lambda i: (0, 0)),       # s_src resident
        ],
        out_specs=pl.BlockSpec((tm, d_pad), lambda i: (i, 0)),
        compiler_params=cparams,
    )(z_bf, sdst, ssrc)

    return out_pad


# --------------------------------------------------------------------------
# Public wrappers (unpadded in / unpadded out).
# --------------------------------------------------------------------------
def gat_layer_forward(feature, fc_weight, attn_weight):
    """Single GATLayer forward (eager relu path) on a dense graph."""
    n, in_dim = feature.shape
    out_dim = fc_weight.shape[1]
    n_pad = _round_up(n, _LANE)
    in_pad = _round_up(in_dim, _LANE)
    h_pad = jnp.zeros((n_pad, in_pad), jnp.float32).at[:n, :in_dim].set(
        feature.astype(jnp.float32))
    out_pad = _gat_layer_padded(h_pad, fc_weight, attn_weight, n)
    return out_pad[:n, :out_dim]


def gat_forward(feature, fc1_weight, attn1_weight, fc2_weight, attn2_weight):
    """Full GAT forward: layer1 -> ELU -> layer2 (ELU fused into layer2's
    projection kernel).  Padded activations flow between layers unchanged."""
    # TODO(synk): at toy sizes, batch many graphs/heads along a leading grid
    # axis in one pallas_call to amortize per-step overhead; kept single-graph
    # here to match the module semantics.
    n, in_dim = feature.shape
    out_dim = fc2_weight.shape[1]
    n_pad = _round_up(n, _LANE)
    in_pad = _round_up(in_dim, _LANE)
    h_pad = jnp.zeros((n_pad, in_pad), jnp.float32).at[:n, :in_dim].set(
        feature.astype(jnp.float32))
    h1 = _gat_layer_padded(h_pad, fc1_weight, attn1_weight, n, apply_elu=False)
    h2 = _gat_layer_padded(h1, fc2_weight, attn2_weight, n, apply_elu=True)
    return h2[:n, :out_dim]


# --------------------------------------------------------------------------
# Pure-JAX references that mirror the kernel's numerics (bf16 MXU operands,
# f32 accumulation, folded attention columns), for verification.
# --------------------------------------------------------------------------
def gat_layer_reference(h, fc_weight, attn_weight):
    d = fc_weight.shape[1]
    a_src = attn_weight[:d, 0]
    a_dst = attn_weight[d:, 0]
    c_src = (fc_weight @ a_src).astype(jnp.bfloat16)
    c_dst = (fc_weight @ a_dst).astype(jnp.bfloat16)
    hb = h.astype(jnp.bfloat16)
    fcb = fc_weight.astype(jnp.bfloat16)
    z = jnp.dot(hb, fcb, preferred_element_type=jnp.float32)          # (N, D)
    s_src = jnp.dot(hb, c_src, preferred_element_type=jnp.float32)    # (N,)
    s_dst = jnp.dot(hb, c_dst, preferred_element_type=jnp.float32)    # (N,)
    e = jnp.maximum(s_dst[:, None] + s_src[None, :], 0.0)
    m = jnp.max(e, axis=1, keepdims=True)
    p = jnp.exp(e - m)
    alpha = (p / jnp.sum(p, axis=1, keepdims=True)).astype(jnp.bfloat16)
    return jnp.dot(alpha, z.astype(jnp.bfloat16),
                   preferred_element_type=jnp.float32)


def gat_reference(feature, fc1_weight, attn1_weight, fc2_weight, attn2_weight):
    h = gat_layer_reference(feature, fc1_weight, attn1_weight)
    h = jnp.where(h > 0.0, h, jnp.expm1(h))                           # ELU
    return gat_layer_reference(h, fc2_weight, attn2_weight)


if __name__ == "__main__":
    # Small shapes consistent with the module: GAT(in_dim, hidden_dim, out_dim).
    N, IN_DIM, HIDDEN_DIM, OUT_DIM = 8, 16, 32, 16

    key = jax.random.PRNGKey(0)
    k_feat, k_fc1, k_a1, k_fc2, k_a2 = jax.random.split(key, 5)

    # "torch.rand"-style uniform [0, 1) parameters / features.
    feature = jax.random.uniform(k_feat, (N, IN_DIM), dtype=jnp.float32)
    fc1_w = jax.random.uniform(k_fc1, (IN_DIM, HIDDEN_DIM), dtype=jnp.float32)
    attn1_w = jax.random.uniform(k_a1, (2 * HIDDEN_DIM, 1), dtype=jnp.float32)
    fc2_w = jax.random.uniform(k_fc2, (HIDDEN_DIM, OUT_DIM), dtype=jnp.float32)
    attn2_w = jax.random.uniform(k_a2, (2 * OUT_DIM, 1), dtype=jnp.float32)

    # Single-layer check (tight: only approx-reciprocal / accumulation order
    # differ from the mirrored reference).
    out1 = jax.block_until_ready(gat_layer_forward(feature, fc1_w, attn1_w))
    ref1 = gat_layer_reference(feature, fc1_w, attn1_w)
    assert out1.shape == (N, HIDDEN_DIM)
    assert jnp.allclose(out1, ref1, rtol=1e-2, atol=1e-2), (
        f"layer1 mismatch: max abs err {jnp.max(jnp.abs(out1 - ref1))}")

    # Full 2-layer GAT (looser: softmax in layer 2 amplifies the tiny layer-1
    # approx-reciprocal differences).
    out = jax.block_until_ready(
        gat_forward(feature, fc1_w, attn1_w, fc2_w, attn2_w))
    ref = gat_reference(feature, fc1_w, attn1_w, fc2_w, attn2_w)
    assert out.shape == (N, OUT_DIM)
    assert jnp.allclose(out, ref, rtol=5e-2, atol=5e-2), (
        f"gat mismatch: max abs err {jnp.max(jnp.abs(out - ref))}")

    print("KERNEL_OK")
</pallas_src>

<mosaic_0001>
module attributes {stable_mosaic.version = 11 : i64} {
  func.func @_proj_kernel(%arg0: i32, %arg1: memref<128x128xf32, #tpu.memory_space<vmem>>, %arg2: memref<128x256xbf16, #tpu.memory_space<vmem>>, %arg3: memref<1x128xbf16, #tpu.memory_space<vmem>>, %arg4: memref<128x128xbf16, #tpu.memory_space<vmem>>, %arg5: memref<128x128xf32, #tpu.memory_space<vmem>>, %arg6: memref<1x128xf32, #tpu.memory_space<vmem>>) attributes {dimension_semantics = [#tpu.dimension_semantics<parallel>], iteration_bounds = array<i64: 1>, scalar_prefetch = 0 : i64, scratch_operands = 0 : i64, tpu.core_type = #tpu.core_type<tc>, window_params = [{transform_indices = @transform_0, window_bounds = array<i64: 128, 128>}, {pipeline_mode = #tpu.pipeline_mode<synchronous>, transform_indices = @transform_1, window_bounds = array<i64: 128, 256>}, {pipeline_mode = #tpu.pipeline_mode<synchronous>, transform_indices = @transform_2, window_bounds = array<i64: 1, 128>}, {transform_indices = @transform_3, window_bounds = array<i64: 128, 128>}, {transform_indices = @transform_4, window_bounds = array<i64: 128, 128>}, {transform_indices = @transform_5, window_bounds = array<i64: 1, 128>}]} {
    %c0 = arith.constant 0 : index
    %c0_0 = arith.constant 0 : index
    %0 = vector.load %arg1[%c0, %c0_0] : memref<128x128xf32, #tpu.memory_space<vmem>>, vector<128x128xf32>
    %1 = arith.truncf %0 : vector<128x128xf32> to vector<128x128xbf16>
    %c0_1 = arith.constant 0 : index
    %c0_2 = arith.constant 0 : index
    %2 = vector.load %arg2[%c0_1, %c0_2] : memref<128x256xbf16, #tpu.memory_space<vmem>>, vector<128x256xbf16>
    %cst = arith.constant dense<0.000000e+00> : vector<128x256xf32>
    %3 = tpu.matmul %1, %2, %cst {dimension_numbers = #tpu.dot_dimension_numbers<[1], [0], [0], [1], [0, 0, 1, 1], [], []>} : vector<128x128xbf16>, vector<128x256xbf16>, vector<128x256xf32> -> vector<128x256xf32>
    %4 = vector.extract_strided_slice %3 {offsets = [0, 0], sizes = [128, 128], strides = [1, 1]} : vector<128x256xf32> to vector<128x128xf32>
    %5 = arith.truncf %4 : vector<128x128xf32> to vector<128x128xbf16>
    %c0_3 = arith.constant 0 : index
    %c0_4 = arith.constant 0 : index
    %6 = vector.load %arg4[%c0_3, %c0_4] : memref<128x128xbf16, #tpu.memory_space<vmem>>, vector<128x128xbf16>
    tpu.vector_store %arg4[%c0_3, %c0_4], %5 {strides = array<i32>} : memref<128x128xbf16, #tpu.memory_space<vmem>>, vector<128x128xbf16>,
    %7 = vector.extract_strided_slice %3 {offsets = [0, 128], sizes = [128, 128], strides = [1, 1]} : vector<128x256xf32> to vector<128x128xf32>
    %c0_5 = arith.constant 0 : index
    %c0_6 = arith.constant 0 : index
    %8 = vector.load %arg5[%c0_5, %c0_6] : memref<128x128xf32, #tpu.memory_space<vmem>>, vector<128x128xf32>
    tpu.vector_store %arg5[%c0_5, %c0_6], %7 {strides = array<i32>} : memref<128x128xf32, #tpu.memory_space<vmem>>, vector<128x128xf32>,
    %c0_7 = arith.constant 0 : index
    %c0_8 = arith.constant 0 : index
    %9 = vector.load %arg3[%c0_7, %c0_8] : memref<1x128xbf16, #tpu.memory_space<vmem>>, vector<1x128xbf16>
    %cst_9 = arith.constant dense<0.000000e+00> : vector<1x128xf32>
    %10 = tpu.matmul %9, %1, %cst_9 {dimension_numbers = #tpu.dot_dimension_numbers<[1], [1], [0], [0], [0, 0, 1, 0], [], []>} : vector<1x128xbf16>, vector<128x128xbf16>, vector<1x128xf32> -> vector<1x128xf32>
    %c0_10 = arith.constant 0 : index
    %c0_11 = arith.constant 0 : index
    %11 = vector.load %arg6[%c0_10, %c0_11] : memref<1x128xf32, #tpu.memory_space<vmem>>, vector<1x128xf32>
    tpu.vector_store %arg6[%c0_10, %c0_11], %10 {strides = array<i32>} : memref<1x128xf32, #tpu.memory_space<vmem>>, vector<1x128xf32>,
    return
  }
  func.func @transform_0(%arg0: i32) -> (i32, i32) {
    %c0_i32 = arith.constant 0 : i32
    %c0_i32_0 = arith.constant 0 : i32
    return %arg0, %c0_i32 : i32, i32
  }
  func.func @transform_1(%arg0: i32) -> (i32, i32) {
    %c0_i32 = arith.constant 0 : i32
    %c0_i32_0 = arith.constant 0 : i32
    %c0_i32_1 = arith.constant 0 : i32
    return %c0_i32, %c0_i32_0 : i32, i32
  }
  func.func @transform_2(%arg0: i32) -> (i32, i32) {
    %c0_i32 = arith.constant 0 : i32
    %c0_i32_0 = arith.constant 0 : i32
    %c0_i32_1 = arith.constant 0 : i32
    return %c0_i32, %c0_i32_0 : i32, i32
  }
  func.func @transform_3(%arg0: i32) -> (i32, i32) {
    %c0_i32 = arith.constant 0 : i32
    %c0_i32_0 = arith.constant 0 : i32
    return %arg0, %c0_i32 : i32, i32
  }
  func.func @transform_4(%arg0: i32) -> (i32, i32) {
    %c0_i32 = arith.constant 0 : i32
    %c0_i32_0 = arith.constant 0 : i32
    return %arg0, %c0_i32 : i32, i32
  }
  func.func @transform_5(%arg0: i32) -> (i32, i32) {
    %c0_i32 = arith.constant 0 : i32
    %c0_i32_0 = arith.constant 0 : i32
    return %c0_i32, %arg0 : i32, i32
  }
}

</mosaic_0001>

<bundles_post_ra>
// kernel: tpu_custom_call.1
= control target key start
LH: loop header
LB: loop body
LE: loop exit
PB: predicated region body
PF: predicated region fallthrough
CT: control target
= control target key end

     0   :  { %11 = vsyncpa [#allocation3], 0  ;;  %s824_s0 = inlined_call_operand.hbm [shape: f32[128,128], index: 0, kind: input, shape index: {}]   ;;  %s825_s1 = inlined_call_operand.hbm [shape: bf16[128,256], index: 1, kind: input, shape index: {}]   ;;  %s826_s2 = inlined_call_operand.vmem [shape: bf16[1,128], index: 2, kind: input, shape index: {}]   ;;  %s827_s3 = inlined_call_operand.hbm [shape: bf16[128,128], index: 3, kind: output, shape index: {0}]   ;;  %s828_s4 = inlined_call_operand.hbm [shape: f32[128,128], index: 4, kind: output, shape index: {1}]   ;;  %s829_s5 = inlined_call_operand.hbm [shape: f32[1,128], index: 5, kind: output, shape index: {2}]  }
   0x1   :  { %12 = vsyncpa [#allocation6], 0 }
   0x2   :  { %13 = vsyncpa [#allocation4], 0 }
   0x3   :  { %14 = vsyncpa [#allocation9], 0  ;;  %s734_s18 = smov [#allocation2]  }
   0x4   :  { %s20_s19 = sshll.u32 %s734_s18, 4  ;;  %s21_s19 = int_to_ptr.vmem [resolvable:$true] %s20_s19 }
   0x5   :  { %s634_s20 = scalar_lea.vmem %s21_s19, 2048  ;;  %p639_p1 = scmp.lt.s32.totalorder %s21_s19, %s21_s19 }
   0x6   :  { %p635_p0 = scmp.ne.s32.totalorder %s21_s19, %s634_s20  ;;  %p640_p2 = scmp.lt.s32.totalorder %s634_s20, %s634_s20 }
   0x8   :  { %p641_p3 = por %p640_p2, %p639_p1 }
   0xa   :  { %p642_p4 = pnand %p641_p3, %p635_p0 }
   0xc   :  { %645 = shalt.err (!%p642_p4)
}
   0xd   :  { %s735_s21 = smov 128   ;;  %s736_s22 = smov 8  }
   0xe   :  { %26 = dma.hbm_to_vmem [thread:$0]  %s824_s0, 2048, %s21_s19, [#allocation3], %s735_s21, %s735_s21, %s736_s22  }
   0xf   :  { %s737_s25 = smov [#allocation5]  }
  0x10   :  { %s32_s26 = sshll.u32 %s737_s25, 4  ;;  %s33_s26 = int_to_ptr.vmem [resolvable:$true] %s32_s26 }
  0x11   :  { %s654_s27 = scalar_lea.vmem %s33_s26, 2048  ;;  %p659_p6 = scmp.lt.s32.totalorder %s33_s26, %s33_s26 }
  0x12   :  { %p655_p5 = scmp.ne.s32.totalorder %s33_s26, %s654_s27  ;;  %p660_p7 = scmp.lt.s32.totalorder %s654_s27, %s654_s27 }
  0x14   :  { %p661_p8 = por %p660_p7, %p659_p6 }
  0x16   :  { %p662_p9 = pnand %p661_p8, %p655_p5 }
  0x18   :  { %665 = shalt.err (!%p662_p9)
}
  0x19   :  { %38 = dma.hbm_to_vmem [thread:$0]  %s825_s1, 2048, %s33_s26, [#allocation6], %s735_s21, %s735_s21, %s736_s22  }
  0x1a   :  { %726 = dma.done.wait [#allocation3], 2048  }
  0x1b   :  { %727 = vsyncadd [#allocation3], 4294965248 }
  0x1c   :  { %728 = dma.done.wait [#allocation6], 2048  }
  0x1d   :  { %729 = vsyncadd [#allocation6], 4294965248  ;;  %v738_v0 = vmov 0.0   ;;  %v739_v1 = vmov 0   ;;  %vm740_vm0 = vmmov 0   ;;  %v62_v9 = vld [vmem:[#allocation2 + $0x70] sm:$0xff] }
  0x1e   :  { %570 = vmatprep.subr.bf16.mxu1 %v738_v0  ;;  %200 = vmatprep.mubr.bf16.mxu0 %v739_v1  ;;  %v602_v2 = vld [vmem:[#allocation5 + $0x74] ss:$8 sps:$4 sm:$0xff]   ;;  %v604_v3 = vld [vmem:[#allocation5 + $0x70] ss:$8 sps:$4 sm:$0xff]   ;;  %v605_v4 = vld [vmem:[#allocation5 + $0x64] ss:$8 sps:$4 sm:$0xff]  }
  0x1f   :  { %586 = vmatprep.mubr.msk.bf16.mxu1 %vm740_vm0, %v738_v0  ;;  %168 = vmatprep.subr.bf16.mxu0 %v602_v2  ;;  %v607_v5 = vld [vmem:[#allocation5 + $0x60] ss:$8 sps:$4 sm:$0xff]   ;;  %v608_v6 = vld [vmem:[#allocation5 + $0x54] ss:$8 sps:$4 sm:$0xff]   ;;  %v610_v7 = vld [vmem:[#allocation5 + $0x50] ss:$8 sps:$4 sm:$0xff]  }
  0x20   :  { %169 = vmatpush1.bf16.msra.mxu0 %v604_v3  ;;  %v611_v8 = vld [vmem:[#allocation5 + $0x44] ss:$8 sps:$4 sm:$0xff]   ;;  %v63_v10 = vld [vmem:[#allocation2 + $0x78] sm:$0xff]  ;;  %v613_v12 = vld [vmem:[#allocation5 + $0x40] ss:$8 sps:$4 sm:$0xff]   ;;  %s742_s6 = smov [#allocation7]  }
  0x21   :  { %170 = vmatprep.subr.bf16.mxu0 %v605_v4  ;;  %v791_v11 = vpack.c.bf16 %v63_v10, %v62_v9  ;;  %v614_v13 = vld [vmem:[#allocation5 + $0x34] ss:$8 sps:$4 sm:$0xff]   ;;  %v60_v14 = vld [vmem:[#allocation2 + $0x60] sm:$0xff]  ;;  %v61_v15 = vld [vmem:[#allocation2 + $0x68] sm:$0xff]  ;;  %s424_s7 = sshll.u32 %s742_s6, 4  ;;  %s743_s8 = smov [#allocation10]   ;;  %s425_s7 = int_to_ptr.vmem [resolvable:$true] %s424_s7 }
  0x22   :  { %v616_v16 = vld [vmem:[#allocation5 + $0x30] ss:$8 sps:$4 sm:$0xff]   ;;  %v70_v17 = vpack.c.bf16 %v61_v15, %v60_v14  ;;  %v617_v18 = vld [vmem:[#allocation5 + $0x24] ss:$8 sps:$4 sm:$0xff]   ;;  %v619_v19 = vld [vmem:[#allocation5 + $0x20] ss:$8 sps:$4 sm:$0xff]  }
  0x23   :  { %571 = vmatpush3.bf16.xpose.msra.mxu1 %v791_v11  ;;  %v620_v20 = vld [vmem:[#allocation5 + $0x14] ss:$8 sps:$4 sm:$0xff]   ;;  %v622_v23 = vld [vmem:[#allocation5 + $0x10] ss:$8 sps:$4 sm:$0xff]   ;;  %v623_v25 = vld [vmem:[#allocation5 + $0x4] ss:$8 sps:$4 sm:$0xff]  }
  0x24   :  { %171 = vmatpush1.bf16.msra.mxu0 %v607_v5  ;;  %572 = vmatprep.subr.bf16.mxu1 %v738_v0  ;;  %v58_v21 = vld [vmem:[#allocation2 + $0x50] sm:$0xff]  ;;  %v59_v22 = vld [vmem:[#allocation2 + $0x58] sm:$0xff]  ;;  %v625_v26 = vld [vmem:[#allocation5] ss:$8 sps:$4 sm:$0xff]   ;;  %s449_s9 = sshll.u32 %s743_s8, 4  ;;  %s450_s9 = int_to_ptr.vmem [resolvable:$true] %s449_s9 }
  0x25   :  { %172 = vmatprep.subr.bf16.mxu0 %v608_v6  ;;  %v69_v24 = vpack.c.bf16 %v59_v22, %v58_v21  ;;  %v48_v27 = vld [vmem:[#allocation2] sm:$0xff]  ;;  %v49_v28 = vld [vmem:[#allocation2 + $0x8] sm:$0xff]  ;;  %v50_v33 = vld [vmem:[#allocation2 + $0x10] sm:$0xff] }
  0x26   :  { %v56_v29 = vld [vmem:[#allocation2 + $0x40] sm:$0xff]  ;;  %v57_v30 = vld [vmem:[#allocation2 + $0x48] sm:$0xff]  ;;  %v64_v31 = vpack.c.bf16 %v49_v28, %v48_v27  ;;  %v51_v34 = vld [vmem:[#allocation2 + $0x18] sm:$0xff] }
  0x27   :  { %v68_v32 = vpack.c.bf16 %v57_v30, %v56_v29  ;;  %v54_v35 = vld [vmem:[#allocation2 + $0x30] sm:$0xff]  ;;  %v55_v36 = vld [vmem:[#allocation2 + $0x38] sm:$0xff]  ;;  %v65_v37 = vpack.c.bf16 %v51_v34, %v50_v33  ;;  %v52_v39 = vld [vmem:[#allocation2 + $0x20] sm:$0xff] }
  0x28   :  { %173 = vmatpush1.bf16.msra.mxu0 %v610_v7  ;;  %v67_v38 = vpack.c.bf16 %v55_v36, %v54_v35  ;;  %v53_v40 = vld [vmem:[#allocation2 + $0x28] sm:$0xff]  ;;  %v377_v42 = vld [vmem:[%s826_s2] sm:$0x1]  ;;  %s741_s2 = smov [#allocation8]  }
  0x29   :  { %174 = vmatprep.subr.bf16.mxu0 %v611_v8  ;;  %v66_v41 = vpack.c.bf16 %v53_v40, %v52_v39  ;;  %s436_s30 = sshll.u32 %s741_s2, 4  ;;  %s437_s30 = int_to_ptr.vmem [resolvable:$true] %s436_s30 }
  0x2a   :  { %s666_s10 = scalar_lea.vmem %s437_s30, 2048  ;;  %p671_p11 = scmp.lt.s32.totalorder %s437_s30, %s437_s30 }
  0x2b   :  { %573 = vmatpush3.bf16.xpose.msra.mxu1 %v70_v17  ;;  %p667_p10 = scmp.ne.s32.totalorder %s437_s30, %s666_s10  ;;  %p672_p12 = scmp.lt.s32.totalorder %s666_s10, %s666_s10 }
  0x2c   :  { %175 = vmatpush1.bf16.msra.mxu0 %v613_v12  ;;  %574 = vmatprep.subr.bf16.mxu1 %v738_v0 }
  0x2d   :  { %176 = vmatprep.subr.bf16.mxu0 %v614_v13  ;;  %p673_p13 = por %p672_p12, %p671_p11 }
  0x2f   :  { %p674_p0 = pnand %p673_p13, %p667_p10 }
  0x30   :  { %177 = vmatpush1.bf16.msra.mxu0 %v616_v16 }
  0x31   :  { %178 = vmatprep.subr.bf16.mxu0 %v617_v18 }
  0x33   :  { %575 = vmatpush3.bf16.xpose.msra.mxu1 %v69_v24 }
  0x34   :  { %179 = vmatpush1.bf16.msra.mxu0 %v619_v19  ;;  %576 = vmatprep.subr.bf16.mxu1 %v738_v0 }
  0x35   :  { %180 = vmatprep.subr.bf16.mxu0 %v620_v20 }
  0x38   :  { %181 = vmatpush1.bf16.msra.mxu0 %v622_v23 }
  0x39   :  { %182 = vmatprep.subr.bf16.mxu0 %v623_v25 }
  0x3b   :  { %577 = vmatpush3.bf16.xpose.msra.mxu1 %v68_v32 }
  0x3c   :  { %183 = vmatpush1.bf16.msra.mxu0 %v625_v26  ;;  %578 = vmatprep.subr.bf16.mxu1 %v738_v0 }
  0x3f   :  { %201 = vmatmul.mubr.bf16.vlgmr.msra.gmra.mxu0 %v64_v31 }
  0x40   :  { %210 = vmatprep.mubr.bf16.mxu0 %v739_v1 }
  0x43   :  { %579 = vmatpush3.bf16.xpose.msra.mxu1 %v67_v38 }
  0x44   :  { %580 = vmatprep.subr.bf16.mxu1 %v738_v0 }
  0x47   :  { %211 = vmatmul.mubr.bf16.gmra.mxu0 %v65_v37 }
  0x48   :  { %220 = vmatprep.mubr.bf16.mxu0 %v739_v1 }
  0x4b   :  { %581 = vmatpush3.bf16.xpose.msra.mxu1 %v66_v41 }
  0x4c   :  { %582 = vmatprep.subr.bf16.mxu1 %v738_v0 }
  0x4f   :  { %221 = vmatmul.mubr.bf16.gmra.mxu0 %v66_v41 }
  0x50   :  { %230 = vmatprep.mubr.bf16.mxu0 %v739_v1 }
  0x53   :  { %583 = vmatpush3.bf16.xpose.msra.mxu1 %v65_v37 }
  0x54   :  { %584 = vmatprep.subr.bf16.mxu1 %v738_v0 }
  0x57   :  { %231 = vmatmul.mubr.bf16.gmra.mxu0 %v67_v38 }
  0x58   :  { %240 = vmatprep.mubr.bf16.mxu0 %v739_v1 }
  0x5b   :  { %585 = vmatpush3.bf16.xpose.msra.mxu1 %v64_v31 }
  0x5f   :  { %241 = vmatmul.mubr.bf16.gmra.mxu0 %v68_v32 }
  0x60   :  { %250 = vmatprep.mubr.bf16.mxu0 %v739_v1 }
  0x62   :  { %587 = vmatmul.mubr.bf16.vlgmr.msra.gmra.mxu1 %v377_v42 }
  0x67   :  { %251 = vmatmul.mubr.bf16.gmra.mxu0 %v69_v24 }
  0x68   :  { %260 = vmatprep.mubr.bf16.mxu0 %v739_v1 }
  0x6f   :  { %261 = vmatmul.mubr.bf16.gmra.mxu0 %v70_v17 }
  0x70   :  { %270 = vmatprep.mubr.bf16.mxu0 %v739_v1 }
  0x77   :  { %271 = vmatmul.mubr.bf16.gmra.mxu0 %v791_v11 }
  0xff   :  { %v202_v43 = vpop.f32.mrf.mxu0 }
 0x101   :  { %v204_v44 = vpop.f32.mrf.mxu0 }
 0x102   :  { %361 = vst [vmem:[#allocation8] sm:$0xff] %v204_v44 }
 0x103   :  { %v206_v45 = vpop.f32.mrf.mxu0 }
 0x104   :  { %v517_v46 = vpack.c.bf16 %v206_v45, %v202_v43 }
 0x105   :  { %v208_v47 = vpop.f32.mrf.mxu0 }
 0x106   :  { %518 = vst [vmem:[#allocation7] sm:$0xff] %v517_v46   ;;  %362 = vst [vmem:[#allocation8 + $0x8] sm:$0xff] %v208_v47 }
 0x107   :  { %v212_v48 = vpop.f32.mrf.mxu0 }
 0x109   :  { %v214_v49 = vpop.f32.mrf.mxu0 }
 0x10a   :  { %363 = vst [vmem:[#allocation8 + $0x10] sm:$0xff] %v214_v49 }
 0x10b   :  { %v216_v50 = vpop.f32.mrf.mxu0 }
 0x10c   :  { %v522_v51 = vpack.c.bf16 %v216_v50, %v212_v48 }
 0x10d   :  { %v218_v52 = vpop.f32.mrf.mxu0 }
 0x10e   :  { %554 = vst [vmem:[#allocation7 + $0x8] sm:$0xff] %v522_v51   ;;  %364 = vst [vmem:[#allocation8 + $0x18] sm:$0xff] %v218_v52 }
 0x10f   :  { %v222_v53 = vpop.f32.mrf.mxu0 }
 0x111   :  { %v224_v54 = vpop.f32.mrf.mxu0 }
 0x112   :  { %365 = vst [vmem:[#allocation8 + $0x20] sm:$0xff] %v224_v54 }
 0x113   :  { %v226_v55 = vpop.f32.mrf.mxu0 }
 0x114   :  { %v527_v56 = vpack.c.bf16 %v226_v55, %v222_v53 }
 0x115   :  { %v228_v57 = vpop.f32.mrf.mxu0 }
 0x116   :  { %555 = vst [vmem:[#allocation7 + $0x10] sm:$0xff] %v527_v56   ;;  %366 = vst [vmem:[#allocation8 + $0x28] sm:$0xff] %v228_v57 }
 0x117   :  { %v232_v58 = vpop.f32.mrf.mxu0 }
 0x119   :  { %v234_v59 = vpop.f32.mrf.mxu0 }
 0x11a   :  { %367 = vst [vmem:[#allocation8 + $0x30] sm:$0xff] %v234_v59 }
 0x11b   :  { %v236_v60 = vpop.f32.mrf.mxu0 }
 0x11c   :  { %v532_v61 = vpack.c.bf16 %v236_v60, %v232_v58 }
 0x11d   :  { %v238_v62 = vpop.f32.mrf.mxu0 }
 0x11e   :  { %556 = vst [vmem:[#allocation7 + $0x18] sm:$0xff] %v532_v61   ;;  %368 = vst [vmem:[#allocation8 + $0x38] sm:$0xff] %v238_v62 }
 0x11f   :  { %v242_v63 = vpop.f32.mrf.mxu0 }
 0x121   :  { %v244_v0 = vpop.f32.mrf.mxu0 }
 0x122   :  { %369 = vst [vmem:[#allocation8 + $0x40] sm:$0xff] %v244_v0  ;;  %v412_v5 = vpop.f32.mrf.mxu1 }
 0x123   :  { %v246_v1 = vpop.f32.mrf.mxu0  ;;  %418 = vst [vmem:[#allocation10] sm:$0x1] %v412_v5 }
 0x124   :  { %v537_v2 = vpack.c.bf16 %v246_v1, %v242_v63  ;;  %v588_v7 = vpop.f32.mrf.mxu1 }
 0x125   :  { %v248_v3 = vpop.f32.mrf.mxu0 }
 0x126   :  { %557 = vst [vmem:[#allocation7 + $0x20] sm:$0xff] %v537_v2   ;;  %370 = vst [vmem:[#allocation8 + $0x48] sm:$0xff] %v248_v3  ;;  %v415_v9 = vpop.f32.mrf.mxu1 }
 0x127   :  { %v252_v4 = vpop.f32.mrf.mxu0 }
 0x128   :  { %v589_v12 = vpop.f32.mrf.mxu1 }
 0x129   :  { %v254_v6 = vpop.f32.mrf.mxu0 }
 0x12a   :  { %371 = vst [vmem:[#allocation8 + $0x50] sm:$0xff] %v254_v6 }
 0x12b   :  { %v256_v8 = vpop.f32.mrf.mxu0 }
 0x12c   :  { %v542_v10 = vpack.c.bf16 %v256_v8, %v252_v4 }
 0x12d   :  { %v258_v11 = vpop.f32.mrf.mxu0 }
 0x12e   :  { %558 = vst [vmem:[#allocation7 + $0x28] sm:$0xff] %v542_v10   ;;  %372 = vst [vmem:[#allocation8 + $0x58] sm:$0xff] %v258_v11 }
 0x12f   :  { %v262_v13 = vpop.f32.mrf.mxu0 }
 0x131   :  { %v264_v14 = vpop.f32.mrf.mxu0 }
 0x132   :  { %373 = vst [vmem:[#allocation8 + $0x60] sm:$0xff] %v264_v14 }
 0x133   :  { %v266_v15 = vpop.f32.mrf.mxu0 }
 0x134   :  { %v547_v16 = vpack.c.bf16 %v266_v15, %v262_v13 }
 0x135   :  { %v268_v17 = vpop.f32.mrf.mxu0 }
 0x136   :  { %559 = vst [vmem:[#allocation7 + $0x30] sm:$0xff] %v547_v16   ;;  %374 = vst [vmem:[#allocation8 + $0x68] sm:$0xff] %v268_v17 }
 0x137   :  { %v272_v18 = vpop.f32.mrf.mxu0 }
 0x139   :  { %v274_v19 = vpop.f32.mrf.mxu0 }
 0x13a   :  { %375 = vst [vmem:[#allocation8 + $0x70] sm:$0xff] %v274_v19 }
 0x13b   :  { %v276_v20 = vpop.f32.mrf.mxu0 }
 0x13c   :  { %v552_v21 = vpack.c.bf16 %v276_v20, %v272_v18 }
 0x13d   :  { %v278_v22 = vpop.f32.mrf.mxu0 }
 0x13e   :  { %560 = vst [vmem:[#allocation7 + $0x38] sm:$0xff] %v552_v21   ;;  %376 = vst [vmem:[#allocation8 + $0x78] sm:$0xff] %v278_v22 }
 0x13f   :  { %677 = shalt.err (!%p674_p0)
}
 0x140   :  { %442 = dma.vmem_to_hbm [thread:$0]  %s437_s30, 2048, %s828_s4, [#allocation9], %s735_s21, %s735_s21, %s736_s22  }
 0x141   :  { %s686_s13 = scalar_lea.vmem %s425_s7, 1024  ;;  %p691_p2 = scmp.lt.s32.totalorder %s425_s7, %s425_s7 }
 0x142   :  { %p687_p1 = scmp.ne.s32.totalorder %s425_s7, %s686_s13  ;;  %p692_p3 = scmp.lt.s32.totalorder %s686_s13, %s686_s13 }
 0x144   :  { %p693_p4 = por %p692_p3, %p691_p2 }
 0x146   :  { %p694_p5 = pnand %p693_p4, %p687_p1 }
 0x148   :  { %697 = shalt.err (!%p694_p5)
}
 0x149   :  { %s744_s14 = smov 64   ;;  %s745_s15 = smov 4  }
 0x14a   :  { %430 = dma.vmem_to_hbm [thread:$0]  %s425_s7, 1024, %s827_s3, [#allocation4], %s744_s14, %s744_s14, %s745_s15  }
 0x14b   :  { %s706_s18 = scalar_lea.vmem %s450_s9, 16  ;;  %s710_s19 = scalar_lea.vmem %s450_s9, 32 }
 0x14c   :  { %p707_p6 = scmp.ne.s32.totalorder %s450_s9, %s706_s18  ;;  %p711_p7 = scmp.lt.s32.totalorder %s450_s9, %s450_s9 }
 0x14d   :  { %p712_p8 = scmp.lt.s32.totalorder %s710_s19, %s706_s18 }
 0x14f   :  { %p713_p9 = por %p712_p8, %p711_p7 }
 0x151   :  { %p714_p10 = pnand %p713_p9, %p707_p6 }
 0x153   :  { %717 = shalt.err (!%p714_p10)
}
 0x154   :  { %452 = dma.vmem_to_hbm [thread:$0]  %s450_s9, 16, %s829_s5, [#allocation9]  }
 0x155   :  { %730 = dma.done.wait [#allocation4], 1024  }
 0x156   :  { %731 = vsyncadd [#allocation4], 4294966272 }
 0x157   :  { %732 = dma.done.wait [#allocation9], 2064  }
 0x158   :  { %733 = vsyncadd [#allocation9], 4294965232 }
 0x159   :  { %462 = vsyncpa [#allocation3], 1 }
 0x15a   :  { %463 = vsyncpa [#allocation6], 1 }
 0x15b   :  { %464 = vsyncpa [#allocation4], 1 }
 0x15c   :  { %465 = vsyncpa [#allocation9], 1 }

</bundles_post_ra>
